<compile_context>
chip_gen: v6e
topology: v6e:2x2x1
jax: 0.10.0
libtpu: 0.0.40
codegen_flags: <defaults>
</compile_context>

<pallas_src>
import functools

import jax
import jax.numpy as jnp
from jax.experimental import pallas as pl
from jax.experimental.pallas import tpu as pltpu


def _repeat_dma_kernel(x_ref, o_hbm_ref, copy_sems, *, times, reps_per_step):
    """x_ref: (B, N*D) VMEM (resident); o_hbm_ref: (times, B, N*D) in HBM."""
    step = pl.program_id(0)
    evenly_divides = (times % reps_per_step) == 0  # static (Python) check

    # Start all stores for this step first so `reps_per_step` DMAs overlap,
    # then wait on all of them before the step ends.
    for j in range(reps_per_step):
        t = step * reps_per_step + j

        def _start(j=j, t=t):
            pltpu.make_async_copy(x_ref, o_hbm_ref.at[t], copy_sems.at[j]).start()

        if evenly_divides:
            _start()
        else:
            pl.when(t < times)(_start)

    for j in range(reps_per_step):
        t = step * reps_per_step + j

        def _wait(j=j, t=t):
            pltpu.make_async_copy(x_ref, o_hbm_ref.at[t], copy_sems.at[j]).wait()

        if evenly_divides:
            _wait()
        else:
            pl.when(t < times)(_wait)


def repeat_vector_3d(x, times, *, max_reps_per_step=8):
    """Pallas implementation of RepeatVector3D(times).forward(x)."""
    B, N, D = x.shape
    ND = N * D
    # Lane-dense 2-D view: last dim N*D maps to lanes; copy is fully contiguous.
    x2 = x.reshape(B, ND)

    reps_per_step = max(1, min(times, max_reps_per_step))
    steps = pl.cdiv(times, reps_per_step)

    kernel = functools.partial(
        _repeat_dma_kernel, times=times, reps_per_step=reps_per_step
    )

    out = pl.pallas_call(
        kernel,
        out_shape=jax.ShapeDtypeStruct((times, B, ND), x.dtype),
        grid_spec=pltpu.PrefetchScalarGridSpec(
            num_scalar_prefetch=0,
            grid=(steps,),
            # Constant index_map -> input block is fetched once and stays
            # resident in VMEM for every grid step on each core.
            in_specs=[pl.BlockSpec((B, ND), lambda s: (0, 0))],
            # Raw HBM output: written only via manual DMA inside the kernel.
            out_specs=pl.BlockSpec(memory_space=pl.ANY),
            scratch_shapes=[pltpu.SemaphoreType.DMA((reps_per_step,))],
        ),
        compiler_params=pltpu.CompilerParams(
            dimension_semantics=("parallel",),
        ),
    )(x2)

    # (times, B, N*D) row-major == (1, times*B, N, D) with out[0, t*B+b] = x[b].
    return out.reshape(1, times * B, N, D)


if __name__ == "__main__":
    key = jax.random.PRNGKey(0)
    B, N, D = 2, 8, 32        # (batch, num_agents, hidden) — small test shapes
    times = 4

    x = jax.random.normal(key, (B, N, D), dtype=jnp.float32)

    out = repeat_vector_3d(x, times)
    out = jax.block_until_ready(out)

    # Reference: exact torch.tile(torch.unsqueeze(x, 0), (1, times, 1, 1)) semantics.
    ref = jnp.tile(x[None, ...], (1, times, 1, 1))

    assert out.shape == (1, times * B, N, D), out.shape
    assert out.dtype == x.dtype
    assert jnp.array_equal(out, ref)

    print("KERNEL_OK")
</pallas_src>

<mosaic_0001>
module attributes {stable_mosaic.version = 11 : i64} {
  func.func @_repeat_dma_kernel(%arg0: i32, %arg1: memref<2x256xf32, #tpu.memory_space<vmem>>, %arg2: memref<4x2x256xf32, #tpu.memory_space<any>>, %arg3: memref<4x!tpu.dma_semaphore, #tpu.memory_space<semaphore_mem>>) attributes {dimension_semantics = [#tpu.dimension_semantics<parallel>], iteration_bounds = array<i64: 1>, scalar_prefetch = 0 : i64, scratch_operands = 1 : i64, tpu.core_type = #tpu.core_type<tc>, window_params = [{pipeline_mode = #tpu.pipeline_mode<synchronous>, transform_indices = @transform_0, window_bounds = array<i64: 2, 256>}, {}]} {
    %c4_i32 = arith.constant 4 : i32
    %0 = arith.muli %arg0, %c4_i32 : i32
    %c0_i32 = arith.constant 0 : i32
    %1 = arith.addi %0, %c0_i32 : i32
    %c0_i32_0 = arith.constant 0 : i32
    %c0_i32_1 = arith.constant 0 : i32
    %c0_i32_2 = arith.constant 0 : i32
    %2 = tpu.memref_slice %arg2[%1, %c0_i32_1, %c0_i32_2] : memref<4x2x256xf32, #tpu.memory_space<any>> -> memref<1x2x256xf32, #tpu.memory_space<any>>
    %3 = tpu.memref_squeeze %2 : memref<1x2x256xf32, #tpu.memory_space<any>> -> memref<2x256xf32, #tpu.memory_space<any>>
    %4 = tpu.memref_slice %arg3[%c0_i32_0] : memref<4x!tpu.dma_semaphore, #tpu.memory_space<semaphore_mem>> -> memref<1x!tpu.dma_semaphore, #tpu.memory_space<semaphore_mem>>
    %5 = tpu.memref_squeeze %4 : memref<1x!tpu.dma_semaphore, #tpu.memory_space<semaphore_mem>> -> memref<!tpu.dma_semaphore, #tpu.memory_space<semaphore_mem>>
    tpu.enqueue_dma source(%arg1 : memref<2x256xf32, #tpu.memory_space<vmem>>) target(%3 : memref<2x256xf32, #tpu.memory_space<any>>) target_semaphore(%5 : memref<!tpu.dma_semaphore, #tpu.memory_space<semaphore_mem>>)
    %c4_i32_3 = arith.constant 4 : i32
    %6 = arith.muli %arg0, %c4_i32_3 : i32
    %c1_i32 = arith.constant 1 : i32
    %7 = arith.addi %6, %c1_i32 : i32
    %c1_i32_4 = arith.constant 1 : i32
    %c0_i32_5 = arith.constant 0 : i32
    %c0_i32_6 = arith.constant 0 : i32
    %8 = tpu.memref_slice %arg2[%7, %c0_i32_5, %c0_i32_6] : memref<4x2x256xf32, #tpu.memory_space<any>> -> memref<1x2x256xf32, #tpu.memory_space<any>>
    %9 = tpu.memref_squeeze %8 : memref<1x2x256xf32, #tpu.memory_space<any>> -> memref<2x256xf32, #tpu.memory_space<any>>
    %10 = tpu.memref_slice %arg3[%c1_i32_4] : memref<4x!tpu.dma_semaphore, #tpu.memory_space<semaphore_mem>> -> memref<1x!tpu.dma_semaphore, #tpu.memory_space<semaphore_mem>>
    %11 = tpu.memref_squeeze %10 : memref<1x!tpu.dma_semaphore, #tpu.memory_space<semaphore_mem>> -> memref<!tpu.dma_semaphore, #tpu.memory_space<semaphore_mem>>
    tpu.enqueue_dma source(%arg1 : memref<2x256xf32, #tpu.memory_space<vmem>>) target(%9 : memref<2x256xf32, #tpu.memory_space<any>>) target_semaphore(%11 : memref<!tpu.dma_semaphore, #tpu.memory_space<semaphore_mem>>)
    %c4_i32_7 = arith.constant 4 : i32
    %12 = arith.muli %arg0, %c4_i32_7 : i32
    %c2_i32 = arith.constant 2 : i32
    %13 = arith.addi %12, %c2_i32 : i32
    %c2_i32_8 = arith.constant 2 : i32
    %c0_i32_9 = arith.constant 0 : i32
    %c0_i32_10 = arith.constant 0 : i32
    %14 = tpu.memref_slice %arg2[%13, %c0_i32_9, %c0_i32_10] : memref<4x2x256xf32, #tpu.memory_space<any>> -> memref<1x2x256xf32, #tpu.memory_space<any>>
    %15 = tpu.memref_squeeze %14 : memref<1x2x256xf32, #tpu.memory_space<any>> -> memref<2x256xf32, #tpu.memory_space<any>>
    %16 = tpu.memref_slice %arg3[%c2_i32_8] : memref<4x!tpu.dma_semaphore, #tpu.memory_space<semaphore_mem>> -> memref<1x!tpu.dma_semaphore, #tpu.memory_space<semaphore_mem>>
    %17 = tpu.memref_squeeze %16 : memref<1x!tpu.dma_semaphore, #tpu.memory_space<semaphore_mem>> -> memref<!tpu.dma_semaphore, #tpu.memory_space<semaphore_mem>>
    tpu.enqueue_dma source(%arg1 : memref<2x256xf32, #tpu.memory_space<vmem>>) target(%15 : memref<2x256xf32, #tpu.memory_space<any>>) target_semaphore(%17 : memref<!tpu.dma_semaphore, #tpu.memory_space<semaphore_mem>>)
    %c4_i32_11 = arith.constant 4 : i32
    %18 = arith.muli %arg0, %c4_i32_11 : i32
    %c3_i32 = arith.constant 3 : i32
    %19 = arith.addi %18, %c3_i32 : i32
    %c3_i32_12 = arith.constant 3 : i32
    %c0_i32_13 = arith.constant 0 : i32
    %c0_i32_14 = arith.constant 0 : i32
    %20 = tpu.memref_slice %arg2[%19, %c0_i32_13, %c0_i32_14] : memref<4x2x256xf32, #tpu.memory_space<any>> -> memref<1x2x256xf32, #tpu.memory_space<any>>
    %21 = tpu.memref_squeeze %20 : memref<1x2x256xf32, #tpu.memory_space<any>> -> memref<2x256xf32, #tpu.memory_space<any>>
    %22 = tpu.memref_slice %arg3[%c3_i32_12] : memref<4x!tpu.dma_semaphore, #tpu.memory_space<semaphore_mem>> -> memref<1x!tpu.dma_semaphore, #tpu.memory_space<semaphore_mem>>
    %23 = tpu.memref_squeeze %22 : memref<1x!tpu.dma_semaphore, #tpu.memory_space<semaphore_mem>> -> memref<!tpu.dma_semaphore, #tpu.memory_space<semaphore_mem>>
    tpu.enqueue_dma source(%arg1 : memref<2x256xf32, #tpu.memory_space<vmem>>) target(%21 : memref<2x256xf32, #tpu.memory_space<any>>) target_semaphore(%23 : memref<!tpu.dma_semaphore, #tpu.memory_space<semaphore_mem>>)
    %c4_i32_15 = arith.constant 4 : i32
    %24 = arith.muli %arg0, %c4_i32_15 : i32
    %c0_i32_16 = arith.constant 0 : i32
    %25 = arith.addi %24, %c0_i32_16 : i32
    %c0_i32_17 = arith.constant 0 : i32
    %c0_i32_18 = arith.constant 0 : i32
    %c0_i32_19 = arith.constant 0 : i32
    %26 = tpu.memref_slice %arg2[%25, %c0_i32_18, %c0_i32_19] : memref<4x2x256xf32, #tpu.memory_space<any>> -> memref<1x2x256xf32, #tpu.memory_space<any>>
    %27 = tpu.memref_squeeze %26 : memref<1x2x256xf32, #tpu.memory_space<any>> -> memref<2x256xf32, #tpu.memory_space<any>>
    %28 = tpu.memref_slice %arg3[%c0_i32_17] : memref<4x!tpu.dma_semaphore, #tpu.memory_space<semaphore_mem>> -> memref<1x!tpu.dma_semaphore, #tpu.memory_space<semaphore_mem>>
    %29 = tpu.memref_squeeze %28 : memref<1x!tpu.dma_semaphore, #tpu.memory_space<semaphore_mem>> -> memref<!tpu.dma_semaphore, #tpu.memory_space<semaphore_mem>>
    tpu.wait_dma2 semaphore(%29 : memref<!tpu.dma_semaphore, #tpu.memory_space<semaphore_mem>>) src(%arg1 : memref<2x256xf32, #tpu.memory_space<vmem>>) dst(%27 : memref<2x256xf32, #tpu.memory_space<any>>)
    %c4_i32_20 = arith.constant 4 : i32
    %30 = arith.muli %arg0, %c4_i32_20 : i32
    %c1_i32_21 = arith.constant 1 : i32
    %31 = arith.addi %30, %c1_i32_21 : i32
    %c1_i32_22 = arith.constant 1 : i32
    %c0_i32_23 = arith.constant 0 : i32
    %c0_i32_24 = arith.constant 0 : i32
    %32 = tpu.memref_slice %arg2[%31, %c0_i32_23, %c0_i32_24] : memref<4x2x256xf32, #tpu.memory_space<any>> -> memref<1x2x256xf32, #tpu.memory_space<any>>
    %33 = tpu.memref_squeeze %32 : memref<1x2x256xf32, #tpu.memory_space<any>> -> memref<2x256xf32, #tpu.memory_space<any>>
    %34 = tpu.memref_slice %arg3[%c1_i32_22] : memref<4x!tpu.dma_semaphore, #tpu.memory_space<semaphore_mem>> -> memref<1x!tpu.dma_semaphore, #tpu.memory_space<semaphore_mem>>
    %35 = tpu.memref_squeeze %34 : memref<1x!tpu.dma_semaphore, #tpu.memory_space<semaphore_mem>> -> memref<!tpu.dma_semaphore, #tpu.memory_space<semaphore_mem>>
    tpu.wait_dma2 semaphore(%35 : memref<!tpu.dma_semaphore, #tpu.memory_space<semaphore_mem>>) src(%arg1 : memref<2x256xf32, #tpu.memory_space<vmem>>) dst(%33 : memref<2x256xf32, #tpu.memory_space<any>>)
    %c4_i32_25 = arith.constant 4 : i32
    %36 = arith.muli %arg0, %c4_i32_25 : i32
    %c2_i32_26 = arith.constant 2 : i32
    %37 = arith.addi %36, %c2_i32_26 : i32
    %c2_i32_27 = arith.constant 2 : i32
    %c0_i32_28 = arith.constant 0 : i32
    %c0_i32_29 = arith.constant 0 : i32
    %38 = tpu.memref_slice %arg2[%37, %c0_i32_28, %c0_i32_29] : memref<4x2x256xf32, #tpu.memory_space<any>> -> memref<1x2x256xf32, #tpu.memory_space<any>>
    %39 = tpu.memref_squeeze %38 : memref<1x2x256xf32, #tpu.memory_space<any>> -> memref<2x256xf32, #tpu.memory_space<any>>
    %40 = tpu.memref_slice %arg3[%c2_i32_27] : memref<4x!tpu.dma_semaphore, #tpu.memory_space<semaphore_mem>> -> memref<1x!tpu.dma_semaphore, #tpu.memory_space<semaphore_mem>>
    %41 = tpu.memref_squeeze %40 : memref<1x!tpu.dma_semaphore, #tpu.memory_space<semaphore_mem>> -> memref<!tpu.dma_semaphore, #tpu.memory_space<semaphore_mem>>
    tpu.wait_dma2 semaphore(%41 : memref<!tpu.dma_semaphore, #tpu.memory_space<semaphore_mem>>) src(%arg1 : memref<2x256xf32, #tpu.memory_space<vmem>>) dst(%39 : memref<2x256xf32, #tpu.memory_space<any>>)
    %c4_i32_30 = arith.constant 4 : i32
    %42 = arith.muli %arg0, %c4_i32_30 : i32
    %c3_i32_31 = arith.constant 3 : i32
    %43 = arith.addi %42, %c3_i32_31 : i32
    %c3_i32_32 = arith.constant 3 : i32
    %c0_i32_33 = arith.constant 0 : i32
    %c0_i32_34 = arith.constant 0 : i32
    %44 = tpu.memref_slice %arg2[%43, %c0_i32_33, %c0_i32_34] : memref<4x2x256xf32, #tpu.memory_space<any>> -> memref<1x2x256xf32, #tpu.memory_space<any>>
    %45 = tpu.memref_squeeze %44 : memref<1x2x256xf32, #tpu.memory_space<any>> -> memref<2x256xf32, #tpu.memory_space<any>>
    %46 = tpu.memref_slice %arg3[%c3_i32_32] : memref<4x!tpu.dma_semaphore, #tpu.memory_space<semaphore_mem>> -> memref<1x!tpu.dma_semaphore, #tpu.memory_space<semaphore_mem>>
    %47 = tpu.memref_squeeze %46 : memref<1x!tpu.dma_semaphore, #tpu.memory_space<semaphore_mem>> -> memref<!tpu.dma_semaphore, #tpu.memory_space<semaphore_mem>>
    tpu.wait_dma2 semaphore(%47 : memref<!tpu.dma_semaphore, #tpu.memory_space<semaphore_mem>>) src(%arg1 : memref<2x256xf32, #tpu.memory_space<vmem>>) dst(%45 : memref<2x256xf32, #tpu.memory_space<any>>)
    return
  }
  func.func @transform_0(%arg0: i32) -> (i32, i32) {
    %c0_i32 = arith.constant 0 : i32
    %c0_i32_0 = arith.constant 0 : i32
    %c0_i32_1 = arith.constant 0 : i32
    return %c0_i32, %c0_i32_0 : i32, i32
  }
}

</mosaic_0001>

<bundles_post_ra>
// kernel: tpu_custom_call.1
= control target key start
LH: loop header
LB: loop body
LE: loop exit
PB: predicated region body
PF: predicated region fallthrough
CT: control target
= control target key end

     0   :  { %6 = vsyncpa [#allocation4], 0  ;;  %s248_s6 = smov [#allocation3]   ;;  %s288_s0 = inlined_call_operand.hbm [shape: f32[2,256], index: 0, kind: input, shape index: {}]   ;;  %s289_s1 = inlined_call_operand.hbm [shape: f32[4,2,256], index: 1, kind: output, shape index: {}]  }
   0x1   :  { %s13_s7 = sshll.u32 %s248_s6, 4  ;;  %s14_s7 = int_to_ptr.vmem [resolvable:$true] %s13_s7 }
   0x2   :  { %s137_s8 = scalar_lea.vmem %s14_s7, 64  ;;  %p142_p1 = scmp.lt.s32.totalorder %s14_s7, %s14_s7 }
   0x3   :  { %p138_p0 = scmp.ne.s32.totalorder %s14_s7, %s137_s8  ;;  %p143_p2 = scmp.lt.s32.totalorder %s137_s8, %s137_s8 }
   0x5   :  { %p144_p3 = por %p143_p2, %p142_p1 }
   0x7   :  { %p259_p4 = pnand %p144_p3, %p138_p0 }
   0x9   :  { %148 = shalt.err (!%p259_p4)
}
   0xa   :  { %16 = dma.hbm_to_vmem [thread:$0]  %s288_s0, 64, %s14_s7, [#allocation4]  }
   0xb   :  { %238 = dma.done.wait [#allocation4], 64  }
   0xc   :  { %239 = vsyncadd [#allocation4], 4294967232  ;;  %s121_s14 = scalar_lea.hbm %s289_s1, 64  ;;  %s122_s17 = scalar_lea.hbm %s289_s1, 128 }
   0xd   :  { %160 = shalt.err (!%p259_p4)  }
   0xe   :  { %34 = dma.vmem_to_hbm [thread:$0]  %s14_s7, 64, %s289_s1, [#allocation2] }
   0xf   :  { %180 = shalt.err (!%p259_p4)  }
  0x10   :  { %50 = dma.vmem_to_hbm [thread:$0]  %s14_s7, 64, %s121_s14, [#allocation2 + $0x1] }
  0x11   :  { %203 = shalt.err (!%p259_p4)  }
  0x12   :  { %66 = dma.vmem_to_hbm [thread:$0]  %s14_s7, 64, %s122_s17, [#allocation2 + $0x2] }
  0x13   :  { %s123_s21 = scalar_lea.hbm %s289_s1, 192 }
  0x14   :  { %226 = shalt.err (!%p259_p4)  }
  0x15   :  { %82 = dma.vmem_to_hbm [thread:$0]  %s14_s7, 64, %s123_s21, [#allocation2 + $0x3] }
  0x16   :  { %240 = dma.done.wait [#allocation2], 64 }
  0x17   :  { %241 = vsyncadd [#allocation2], 4294967232 }
  0x18   :  { %242 = dma.done.wait [#allocation2 + $0x1], 64 }
  0x19   :  { %243 = vsyncadd [#allocation2 + $0x1], 4294967232 }
  0x1a   :  { %244 = dma.done.wait [#allocation2 + $0x2], 64 }
  0x1b   :  { %245 = vsyncadd [#allocation2 + $0x2], 4294967232 }
  0x1c   :  { %246 = dma.done.wait [#allocation2 + $0x3], 64 }
  0x1d   :  { %247 = vsyncadd [#allocation2 + $0x3], 4294967232 }
  0x1e   :  { %93 = vsyncpa [#allocation4], 1 }
  0x1f   :  { %94 = vsyncmov [#allocation2] }
  0x22   :  { %s95_s22 = vpop.sfrf %94 }
  0x23   :  { %p124_p5 = scmp.ne.s32.totalorder %s95_s22, 0 }
  0x25   :  { %99 = shalt.err (%p124_p5)  }
  0x26   :  { %101 = vsyncmov [#allocation2 + $0x1] }
  0x29   :  { %s102_s23 = vpop.sfrf %101 }
  0x2a   :  { %p125_p6 = scmp.ne.s32.totalorder %s102_s23, 0 }
  0x2c   :  { %106 = shalt.err (%p125_p6)  }
  0x2d   :  { %108 = vsyncmov [#allocation2 + $0x2] }
  0x30   :  { %s109_s1 = vpop.sfrf %108 }
  0x31   :  { %p126_p7 = scmp.ne.s32.totalorder %s109_s1, 0 }
  0x33   :  { %113 = shalt.err (%p126_p7)  }
  0x34   :  { %115 = vsyncmov [#allocation2 + $0x3] }
  0x37   :  { %s116_s24 = vpop.sfrf %115 }
  0x38   :  { %p127_p8 = scmp.ne.s32.totalorder %s116_s24, 0 }
  0x3a   :  { %120 = shalt.err (%p127_p8)  }

</bundles_post_ra>
